<compile_context>
chip_gen: v6e
topology: v6e:2x2x1
jax: 0.10.0
libtpu: 0.0.40
codegen_flags: <defaults>
</compile_context>

<pallas_src>
import jax
import jax.numpy as jnp
from jax import lax
from jax.experimental import pallas as pl
from jax.experimental.pallas import tpu as pltpu


def relation_net_kernel(x_ref, w1_ref, b1_ref, w2_ref, b2_ref, o_ref):
    # fc1 on the MXU: (TB, In) bf16 @ (In, H) bf16 -> (TB, H) f32.
    h = jnp.dot(x_ref[...], w1_ref[...], preferred_element_type=jnp.float32)
    # bias + ReLU on the VPU (f32 everywhere post-MXU; safe on v5e too).
    h = jnp.maximum(h + b1_ref[...], 0.0)
    # fc2 as w2 @ h^T: (1, H) x (H, TB) -> (1, TB).  The result has the batch
    # rows on the lane axis, so the store below is a full, unmasked vst
    # (lane-dense output slab) instead of per-row masked partial stores.
    y = lax.dot_general(
        w2_ref[...], h,
        dimension_numbers=(((1,), (1,)), ((), ())),   # contract over H ("a @ b.T")
        preferred_element_type=jnp.float32,
    )
    y = y + b2_ref[0, 0]                               # scalar fc2 bias from SMEM
    # sigmoid: exp -> EUP; approx reciprocal -> EUP (keeps the epilogue off the VPU).
    o_ref[...] = pl.reciprocal(1.0 + jnp.exp(-y), approx=True).astype(o_ref.dtype)


def relation_network_forward(x, w1, b1, w2, b2, *, tb=256):
    """x: (B, In) f32; w1: (In, H); b1: (1, H); w2: (1, H); b2: (1, 1) -> (B, 1) f32.

    For production relation-network batches (batch * n_object_pairs rows),
    use tb in the 2048-4096 range; at In=64 even double-buffered bf16 tiles
    are well under VMEM limits on v5e/v6e/v7x.
    """
    B, In = x.shape
    H = w1.shape[1]

    # Lane-dense output tiles require tb to be a multiple of 128.
    tb = max(128, ((int(tb) + 127) // 128) * 128)
    n_tiles = pl.cdiv(B, tb)
    Bp = n_tiles * tb
    if Bp != B:
        x = jnp.pad(x, ((0, Bp - B), (0, 0)))          # padded rows sliced off below

    # HBM-bound op: halve the bytes of the dominant stream (x) and of w1.
    # Accumulation and all post-MXU math stay f32.
    x_bf16 = x.astype(jnp.bfloat16)
    w1_bf16 = w1.astype(jnp.bfloat16)
    b1 = b1.reshape(1, H).astype(jnp.float32)
    w2 = w2.reshape(1, H).astype(jnp.float32)
    b2 = b2.reshape(1, 1).astype(jnp.float32)

    out = pl.pallas_call(
        relation_net_kernel,
        out_shape=jax.ShapeDtypeStruct((1, Bp), jnp.float32),
        grid=(n_tiles,),
        in_specs=[
            # Activations: one (tb, In) tile per step, pipelined against compute.
            # If a v7x profile still shows exposed DMA, add
            # pipeline_mode=pl.Buffered(3) to this spec.
            pl.BlockSpec((tb, In), lambda i: (i, 0)),
            # Weights / biases: constant block index -> resident, DMA'd once.
            pl.BlockSpec((In, H), lambda i: (0, 0)),
            pl.BlockSpec((1, H), lambda i: (0, 0)),
            pl.BlockSpec((1, H), lambda i: (0, 0)),
            # Scalar fc2 bias in SMEM.
            pl.BlockSpec(memory_space=pltpu.SMEM),
        ],
        # Lane-dense output: each step writes a (1, tb) slab at lane offset i*tb.
        out_specs=pl.BlockSpec((1, tb), lambda i: (0, i)),
        compiler_params=pltpu.CompilerParams(
            dimension_semantics=("parallel",)),
    )(x_bf16, w1_bf16, b1, w2, b2)

    # Back to the PyTorch layout (B, 1).
    return out[0, :B].reshape(B, 1)


def reference_forward(x, w1, b1, w2, b2):
    h = jnp.maximum(x @ w1 + b1.reshape(1, -1), 0.0)
    return jax.nn.sigmoid(h @ w2.reshape(1, -1).T + b2.reshape(1, 1))


if __name__ == "__main__":
    # RelationNetwork(input_size=64, hidden_size=32).
    input_size, hidden_size = 64, 32

    key = jax.random.PRNGKey(0)
    kx, kx2, kw1, kb1, kw2, kb2 = jax.random.split(key, 6)

    bound1 = 1.0 / (input_size ** 0.5)
    bound2 = 1.0 / (hidden_size ** 0.5)
    w1 = jax.random.uniform(kw1, (input_size, hidden_size), jnp.float32, -bound1, bound1)
    b1 = jax.random.uniform(kb1, (1, hidden_size), jnp.float32, -bound1, bound1)
    w2 = jax.random.uniform(kw2, (1, hidden_size), jnp.float32, -bound2, bound2)
    b2 = jax.random.uniform(kb2, (1, 1), jnp.float32, -bound2, bound2)

    # Small batch of relation pairs (single tile + padding path).
    x_small = jax.random.normal(kx, (8, input_size), dtype=jnp.float32)
    out_small = jax.block_until_ready(
        relation_network_forward(x_small, w1, b1, w2, b2, tb=128))
    ref_small = reference_forward(x_small, w1, b1, w2, b2)
    assert out_small.shape == (8, 1), out_small.shape
    # bf16 inputs + approx reciprocal -> loosened tolerance vs f32 reference.
    assert jnp.allclose(out_small, ref_small, atol=2e-2, rtol=2e-2), "mismatch (small)"

    # Multi-tile batch (exercises the grid / index maps / padding; still tiny).
    x_multi = jax.random.normal(kx2, (300, input_size), dtype=jnp.float32)
    out_multi = jax.block_until_ready(
        relation_network_forward(x_multi, w1, b1, w2, b2, tb=128))
    ref_multi = reference_forward(x_multi, w1, b1, w2, b2)
    assert out_multi.shape == (300, 1), out_multi.shape
    assert jnp.allclose(out_multi, ref_multi, atol=2e-2, rtol=2e-2), "mismatch (multi)"

    print("KERNEL_OK")
</pallas_src>

<mosaic_0001>
module attributes {stable_mosaic.version = 11 : i64} {
  func.func @relation_net_kernel(%arg0: i32, %arg1: memref<128x64xbf16, #tpu.memory_space<vmem>>, %arg2: memref<64x32xbf16, #tpu.memory_space<vmem>>, %arg3: memref<1x32xf32, #tpu.memory_space<vmem>>, %arg4: memref<1x32xf32, #tpu.memory_space<vmem>>, %arg5: memref<1x1xf32, #tpu.memory_space<smem>>, %arg6: memref<1x128xf32, #tpu.memory_space<vmem>>) attributes {dimension_semantics = [#tpu.dimension_semantics<parallel>], iteration_bounds = array<i64: 1>, scalar_prefetch = 0 : i64, scratch_operands = 0 : i64, tpu.core_type = #tpu.core_type<tc>, window_params = [{transform_indices = @transform_0, window_bounds = array<i64: 128, 64>}, {pipeline_mode = #tpu.pipeline_mode<synchronous>, transform_indices = @transform_1, window_bounds = array<i64: 64, 32>}, {pipeline_mode = #tpu.pipeline_mode<synchronous>, transform_indices = @transform_2, window_bounds = array<i64: 1, 32>}, {pipeline_mode = #tpu.pipeline_mode<synchronous>, transform_indices = @transform_3, window_bounds = array<i64: 1, 32>}, {transform_indices = @transform_4, window_bounds = array<i64: 1, 1>}, {transform_indices = @transform_5, window_bounds = array<i64: 1, 128>}]} {
    %c0 = arith.constant 0 : index
    %c0_0 = arith.constant 0 : index
    %0 = vector.load %arg1[%c0, %c0_0] : memref<128x64xbf16, #tpu.memory_space<vmem>>, vector<128x64xbf16>
    %c0_1 = arith.constant 0 : index
    %c0_2 = arith.constant 0 : index
    %1 = vector.load %arg2[%c0_1, %c0_2] : memref<64x32xbf16, #tpu.memory_space<vmem>>, vector<64x32xbf16>
    %cst = arith.constant dense<0.000000e+00> : vector<128x32xf32>
    %2 = tpu.matmul %0, %1, %cst {dimension_numbers = #tpu.dot_dimension_numbers<[1], [0], [0], [1], [0, 0, 1, 1], [], []>} : vector<128x64xbf16>, vector<64x32xbf16>, vector<128x32xf32> -> vector<128x32xf32>
    %c0_3 = arith.constant 0 : index
    %c0_4 = arith.constant 0 : index
    %3 = vector.load %arg3[%c0_3, %c0_4] : memref<1x32xf32, #tpu.memory_space<vmem>>, vector<1x32xf32>
    %4 = vector.broadcast %3 : vector<1x32xf32> to vector<128x32xf32>
    %5 = arith.addf %2, %4 : vector<128x32xf32>
    %cst_5 = arith.constant 0.000000e+00 : f32
    %6 = vector.broadcast %cst_5 : f32 to vector<128x32xf32>
    %7 = arith.maximumf %5, %6 : vector<128x32xf32>
    %c0_6 = arith.constant 0 : index
    %c0_7 = arith.constant 0 : index
    %8 = vector.load %arg4[%c0_6, %c0_7] : memref<1x32xf32, #tpu.memory_space<vmem>>, vector<1x32xf32>
    %cst_8 = arith.constant dense<0.000000e+00> : vector<1x128xf32>
    %9 = tpu.matmul %8, %7, %cst_8 {dimension_numbers = #tpu.dot_dimension_numbers<[1], [1], [0], [0], [0, 0, 1, 0], [], []>} : vector<1x32xf32>, vector<128x32xf32>, vector<1x128xf32> -> vector<1x128xf32>
    %c0_9 = arith.constant 0 : index
    %c0_10 = arith.constant 0 : index
    %10 = memref.load %arg5[%c0_9, %c0_10] : memref<1x1xf32, #tpu.memory_space<smem>>
    %11 = vector.broadcast %10 : f32 to vector<1x128xf32>
    %12 = arith.addf %9, %11 : vector<1x128xf32>
    %cst_11 = arith.constant 0.000000e+00 : f32
    %13 = vector.broadcast %cst_11 : f32 to vector<1x128xf32>
    %14 = arith.subf %13, %12 : vector<1x128xf32>
    %15 = math.exp %14 : vector<1x128xf32>
    %cst_12 = arith.constant 1.000000e+00 : f32
    %16 = vector.broadcast %cst_12 : f32 to vector<1x128xf32>
    %17 = arith.addf %16, %15 : vector<1x128xf32>
    %18 = tpu.reciprocal %17 {approx = true} : vector<1x128xf32> -> vector<1x128xf32>
    %c0_13 = arith.constant 0 : index
    %c0_14 = arith.constant 0 : index
    %19 = vector.load %arg6[%c0_13, %c0_14] : memref<1x128xf32, #tpu.memory_space<vmem>>, vector<1x128xf32>
    tpu.vector_store %arg6[%c0_13, %c0_14], %18 {strides = array<i32>} : memref<1x128xf32, #tpu.memory_space<vmem>>, vector<1x128xf32>,
    return
  }
  func.func @transform_0(%arg0: i32) -> (i32, i32) {
    %c0_i32 = arith.constant 0 : i32
    %c0_i32_0 = arith.constant 0 : i32
    return %arg0, %c0_i32 : i32, i32
  }
  func.func @transform_1(%arg0: i32) -> (i32, i32) {
    %c0_i32 = arith.constant 0 : i32
    %c0_i32_0 = arith.constant 0 : i32
    %c0_i32_1 = arith.constant 0 : i32
    return %c0_i32, %c0_i32_0 : i32, i32
  }
  func.func @transform_2(%arg0: i32) -> (i32, i32) {
    %c0_i32 = arith.constant 0 : i32
    %c0_i32_0 = arith.constant 0 : i32
    %c0_i32_1 = arith.constant 0 : i32
    return %c0_i32, %c0_i32_0 : i32, i32
  }
  func.func @transform_3(%arg0: i32) -> (i32, i32) {
    %c0_i32 = arith.constant 0 : i32
    %c0_i32_0 = arith.constant 0 : i32
    %c0_i32_1 = arith.constant 0 : i32
    return %c0_i32, %c0_i32_0 : i32, i32
  }
  func.func @transform_4(%arg0: i32) -> (i32, i32) {
    %c0_i32 = arith.constant 0 : i32
    %c0_i32_0 = arith.constant 0 : i32
    %c0_i32_1 = arith.constant 0 : i32
    return %c0_i32, %c0_i32_0 : i32, i32
  }
  func.func @transform_5(%arg0: i32) -> (i32, i32) {
    %c0_i32 = arith.constant 0 : i32
    %c0_i32_0 = arith.constant 0 : i32
    return %c0_i32, %arg0 : i32, i32
  }
}

</mosaic_0001>

<bundles_post_ra>
// kernel: tpu_custom_call.1
= control target key start
LH: loop header
LB: loop body
LE: loop exit
PB: predicated region body
PF: predicated region fallthrough
CT: control target
= control target key end

     0   :  { %vm118_vm0 = vcmask 523264   ;;  %s700_s0 = inlined_call_operand.vmem [shape: bf16[128,64], index: 0, kind: input, shape index: {}]   ;;  %s701_s1 = inlined_call_operand.vmem [shape: bf16[64,32], index: 1, kind: input, shape index: {}]   ;;  %s702_s2 = inlined_call_operand.vmem [shape: f32[1,32], index: 2, kind: input, shape index: {}]   ;;  %s703_s3 = inlined_call_operand.vmem [shape: f32[1,32], index: 3, kind: input, shape index: {}]   ;;  %s704_s4 = inlined_call_operand.<no memory space> [shape: f32[1,1], index: 4, kind: input, shape index: {}]   ;;  %s705_s5 = inlined_call_operand.hbm [shape: f32[1,128], index: 5, kind: output, shape index: {}]  }
   0x1   :  { %v530_v0 = vld [vmem:[%s701_s1 + $0x18] sm:$0xff]   ;;  %v531_v1 = vld [vmem:[%s701_s1 + $0x10] sm:$0xff]   ;;  %v532_v2 = vld [vmem:[%s701_s1 + $0x8] sm:$0xff]  }
   0x2   :  { %468 = vmatprep.subr.bf16.mxu0 %v530_v0  ;;  %v534_v3 = vld [vmem:[%s700_s0] sm:$0xff]  }
   0x3   :  { %469 = vmatpush3.bf16.msra.mxu0 %v530_v0  ;;  %476 = vmatprep.mubr.msk.bf16.mxu0 %vm118_vm0, %v534_v3  ;;  %v533_v4 = vld [vmem:[%s701_s1] sm:$0xff]  }
   0x4   :  { %470 = vmatprep.subr.bf16.mxu0 %v531_v1 }
   0x7   :  { %471 = vmatpush3.bf16.msra.mxu0 %v531_v1 }
   0x8   :  { %472 = vmatprep.subr.bf16.mxu0 %v532_v2 }
   0xb   :  { %473 = vmatpush3.bf16.msra.mxu0 %v532_v2 }
   0xc   :  { %474 = vmatprep.subr.bf16.mxu0 %v533_v4 }
   0xd   :  { %11 = vsyncpa [#allocation4], 0  ;;  %v535_v5 = vld [vmem:[%s700_s0 + $0x8] sm:$0xff]   ;;  %v536_v6 = vld [vmem:[%s700_s0 + $0x10] sm:$0xff]   ;;  %v568_v12 = vmov 0.0   ;;  %vm569_vm1 = vmmov 0   ;;  %v258_v63 = vstv %s704_s4 }
   0xe   :  { %v537_v7 = vld [vmem:[%s700_s0 + $0x18] sm:$0xff]   ;;  %v538_v8 = vld [vmem:[%s700_s0 + $0x20] sm:$0xff]   ;;  %v539_v9 = vld [vmem:[%s700_s0 + $0x28] sm:$0xff]   ;;  %492 = vmatprep.subr.mxu1 %v568_v12  ;;  %524 = vmatprep.mubr.msk.f32.mxu1 %vm569_vm1, %v568_v12  ;;  %vm259_vm2 = vcmask 261120   ;;  %s570_s20 = smov [#allocation3]  }
   0xf   :  { %475 = vmatpush3.bf16.msra.mxu0 %v533_v4  ;;  %v540_v10 = vld [vmem:[%s700_s0 + $0x30] sm:$0xff]   ;;  %v541_v11 = vld [vmem:[%s700_s0 + $0x38] sm:$0xff]   ;;  %v401_v27 = vld [vmem:[%s702_s2] ss:$0 sm:$0xff]  ;;  %s393_s21 = sshll.u32 %s570_s20, 4  ;;  %s394_s21 = int_to_ptr.vmem [resolvable:$true] %s393_s21 }
  0x10   :  { %v256_v62 = vld [vmem:[%s703_s3] sm:$0x1]  ;;  %s546_s3 = scalar_lea.vmem %s394_s21, 16  ;;  %s550_s22 = scalar_lea.vmem %s394_s21, 32 }
  0x11   :  { %p547_p0 = scmp.ne.s32.totalorder %s394_s21, %s546_s3  ;;  %p551_p1 = scmp.lt.s32.totalorder %s394_s21, %s394_s21 }
  0x12   :  { %477 = vmatmul.mubr.msk.bf16.vlgmr.msra.gmra.mxu0 %vm118_vm0, %v535_v5  ;;  %p552_p2 = scmp.lt.s32.totalorder %s550_s22, %s546_s3 }
  0x13   :  { %480 = vmatprep.mubr.msk.bf16.mxu0 %vm118_vm0, %v536_v6 }
  0x14   :  { %p553_p3 = por %p552_p2, %p551_p1 }
  0x16   :  { %p554_p4 = pnand %p553_p3, %p547_p0 }
  0x1a   :  { %481 = vmatmul.mubr.msk.bf16.gmra.mxu0 %vm118_vm0, %v537_v7 }
  0x1b   :  { %484 = vmatprep.mubr.msk.bf16.mxu0 %vm118_vm0, %v538_v8 }
  0x22   :  { %485 = vmatmul.mubr.msk.bf16.gmra.mxu0 %vm118_vm0, %v539_v9 }
  0x23   :  { %488 = vmatprep.mubr.msk.bf16.mxu0 %vm118_vm0, %v540_v10 }
  0x2a   :  { %489 = vmatmul.mubr.msk.bf16.gmra.mxu0 %vm118_vm0, %v541_v11 }
  0xd2   :  { %v647_v13 = vpop.f32.mrf.mxu0 }
  0xd3   :  { %v186_v55 = vadd.f32 %v647_v13, %v401_v27 }
  0xd4   :  { %v649_v14 = vpop.f32.mrf.mxu0 }
  0xd5   :  { %v242_v57 = vmax.f32 %v186_v55, 0.0  ;;  %v178_v59 = vadd.f32 %v401_v27, %v649_v14 }
  0xd6   :  { %v479_v15 = vpop.f32.mrf.mxu0 }
  0xd7   :  { %v189_v53 = vadd.f32 %v479_v15, %v401_v27  ;;  %v240_v61 = vmax.f32 %v178_v59, 0.0 }
  0xd8   :  { %v651_v16 = vpop.f32.mrf.mxu0 }
  0xd9   :  { %v243_v56 = vmax.f32 %v189_v53, 0.0  ;;  %v181_v58 = vadd.f32 %v401_v27, %v651_v16 }
  0xda   :  { %v482_v17 = vpop.f32.mrf.mxu0 }
  0xdb   :  { %v202_v47 = vadd.f32 %v482_v17, %v401_v27  ;;  %v241_v60 = vmax.f32 %v181_v58, 0.0 }
  0xdc   :  { %v193_v18 = vpop.f32.mrf.mxu0 }
  0xdd   :  { %v246_v49 = vmax.f32 %v202_v47, 0.0  ;;  %v194_v51 = vadd.f32 %v401_v27, %v193_v18 }
  0xde   :  { %v483_v19 = vpop.f32.mrf.mxu0 }
  0xdf   :  { %v205_v45 = vadd.f32 %v483_v19, %v401_v27  ;;  %v244_v54 = vmax.f32 %v194_v51, 0.0 }
  0xe0   :  { %v196_v20 = vpop.f32.mrf.mxu0 }
  0xe1   :  { %v247_v48 = vmax.f32 %v205_v45, 0.0  ;;  %v197_v50 = vadd.f32 %v401_v27, %v196_v20 }
  0xe2   :  { %v486_v21 = vpop.f32.mrf.mxu0 }
  0xe3   :  { %v218_v39 = vadd.f32 %v486_v21, %v401_v27  ;;  %v245_v52 = vmax.f32 %v197_v50, 0.0 }
  0xe4   :  { %v209_v22 = vpop.f32.mrf.mxu0 }
  0xe5   :  { %v250_v41 = vmax.f32 %v218_v39, 0.0  ;;  %v210_v43 = vadd.f32 %v401_v27, %v209_v22 }
  0xe6   :  { %v487_v23 = vpop.f32.mrf.mxu0 }
  0xe7   :  { %v221_v37 = vadd.f32 %v487_v23, %v401_v27  ;;  %v248_v46 = vmax.f32 %v210_v43, 0.0 }
  0xe8   :  { %v212_v24 = vpop.f32.mrf.mxu0 }
  0xe9   :  { %v251_v40 = vmax.f32 %v221_v37, 0.0  ;;  %v213_v42 = vadd.f32 %v401_v27, %v212_v24 }
  0xea   :  { %v490_v25 = vpop.f32.mrf.mxu0 }
  0xeb   :  { %v234_v30 = vadd.f32 %v490_v25, %v401_v27  ;;  %v249_v44 = vmax.f32 %v213_v42, 0.0 }
  0xec   :  { %v225_v26 = vpop.f32.mrf.mxu0 }
  0xed   :  { %v254_v33 = vmax.f32 %v234_v30, 0.0  ;;  %v226_v35 = vadd.f32 %v401_v27, %v225_v26 }
  0xee   :  { %v491_v28 = vpop.f32.mrf.mxu0 }
  0xef   :  { %v237_v29 = vadd.f32 %v491_v28, %v401_v27  ;;  %v252_v38 = vmax.f32 %v226_v35, 0.0 }
  0xf0   :  { %v228_v32 = vpop.f32.mrf.mxu0 }
  0xf1   :  { %v255_v31 = vmax.f32 %v237_v29, 0.0  ;;  %v229_v34 = vadd.f32 %v401_v27, %v228_v32 }
  0xf3   :  { %493 = vmatpush3.xpose.msk.msra.mxu1 %vm259_vm2, %v255_v31  ;;  %v253_v36 = vmax.f32 %v229_v34, 0.0 }
  0xf4   :  { %494 = vmatprep.subr.mxu1 %v568_v12 }
  0xf7   :  { %495 = vmatpush3.xpose.msk.msra.mxu1 %vm259_vm2, %v254_v33 }
  0xf8   :  { %496 = vmatprep.subr.mxu1 %v568_v12 }
  0xfb   :  { %497 = vmatpush3.xpose.msk.msra.mxu1 %vm259_vm2, %v253_v36 }
  0xfc   :  { %498 = vmatprep.subr.mxu1 %v568_v12 }
  0xff   :  { %499 = vmatpush3.xpose.msk.msra.mxu1 %vm259_vm2, %v252_v38 }
 0x100   :  { %500 = vmatprep.subr.mxu1 %v568_v12 }
 0x103   :  { %501 = vmatpush3.xpose.msk.msra.mxu1 %vm259_vm2, %v251_v40 }
 0x104   :  { %502 = vmatprep.subr.mxu1 %v568_v12 }
 0x107   :  { %503 = vmatpush3.xpose.msk.msra.mxu1 %vm259_vm2, %v250_v41 }
 0x108   :  { %504 = vmatprep.subr.mxu1 %v568_v12 }
 0x10b   :  { %505 = vmatpush3.xpose.msk.msra.mxu1 %vm259_vm2, %v249_v44 }
 0x10c   :  { %506 = vmatprep.subr.mxu1 %v568_v12 }
 0x10f   :  { %507 = vmatpush3.xpose.msk.msra.mxu1 %vm259_vm2, %v248_v46 }
 0x110   :  { %508 = vmatprep.subr.mxu1 %v568_v12 }
 0x113   :  { %509 = vmatpush3.xpose.msk.msra.mxu1 %vm259_vm2, %v247_v48 }
 0x114   :  { %510 = vmatprep.subr.mxu1 %v568_v12 }
 0x117   :  { %511 = vmatpush3.xpose.msk.msra.mxu1 %vm259_vm2, %v246_v49 }
 0x118   :  { %512 = vmatprep.subr.mxu1 %v568_v12 }
 0x11b   :  { %513 = vmatpush3.xpose.msk.msra.mxu1 %vm259_vm2, %v245_v52 }
 0x11c   :  { %514 = vmatprep.subr.mxu1 %v568_v12 }
 0x11f   :  { %515 = vmatpush3.xpose.msk.msra.mxu1 %vm259_vm2, %v244_v54 }
 0x120   :  { %516 = vmatprep.subr.mxu1 %v568_v12 }
 0x123   :  { %517 = vmatpush3.xpose.msk.msra.mxu1 %vm259_vm2, %v243_v56 }
 0x124   :  { %518 = vmatprep.subr.mxu1 %v568_v12 }
 0x127   :  { %519 = vmatpush3.xpose.msk.msra.mxu1 %vm259_vm2, %v242_v57 }
 0x128   :  { %520 = vmatprep.subr.mxu1 %v568_v12 }
 0x12b   :  { %521 = vmatpush3.xpose.msk.msra.mxu1 %vm259_vm2, %v241_v60 }
 0x12c   :  { %522 = vmatprep.subr.mxu1 %v568_v12 }
 0x12f   :  { %523 = vmatpush3.xpose.msk.msra.mxu1 %vm259_vm2, %v240_v61 }
 0x132   :  { %525 = vmatmul.mubr.msk.f32.vlgmr.msra.gmra.mxu1 %vm259_vm2, %v256_v62 }
 0x1f2   :  { %v377_v0 = vpop.f32.mrf.mxu1 }
 0x1f3   :  { %v378_v1 = vadd.f32 %v377_v0, %v258_v63 }
 0x1f4   :  { %v526_v2 = vpop.f32.mrf.mxu1 }
 0x1f5   :  { %v381_v3 = vsub.f32 0.0, %v378_v1 }
 0x1f7   :  { %v382_v4 = vmul.f32 1.442695, %v381_v3 }
 0x1f9   :  { %542 = vpow2.f32 %v382_v4 }
 0x206   :  { %v543_v5 = vpop.eup %542 }
 0x207   :  { %v384_v6 = vadd.f32 1.0, %v543_v5 }
 0x209   :  { %544 = vrcp.f32 %v384_v6 }
 0x216   :  { %v545_v7 = vpop.eup %544 }
 0x217   :  { %386 = vst [vmem:[#allocation3] sm:$0x1] %v545_v7 }
 0x218   :  { %557 = shalt.err (!%p554_p4)
}
 0x219   :  { %396 = dma.vmem_to_hbm [thread:$0]  %s394_s21, 16, %s705_s5, [#allocation4]  }
 0x21a   :  { %566 = dma.done.wait [#allocation4], 16  }
 0x21b   :  { %567 = vsyncadd [#allocation4], 4294967280 }
 0x21c   :  { %400 = vsyncpa [#allocation4], 1 }

</bundles_post_ra>
